<compile_context>
chip_gen: v6e
topology: v6e:2x2x1
jax: 0.10.0
libtpu: 0.0.40
codegen_flags: <defaults>
</compile_context>

<pallas_src>
import functools
import math

import jax
import jax.numpy as jnp
from jax import lax
from jax.experimental import pallas as pl
from jax.experimental.pallas import tpu as pltpu


def _pick_tile(n, cap, align=1):
    """Largest tile <= cap that divides n and is `align`-aligned (else n)."""
    if n <= cap:
        return n
    for t in range(cap, 0, -1):
        if n % t == 0 and t % align == 0:
            return t
    return n


# ------------------------------ tiled matmul -------------------------------

def _matmul_kernel(a_ref, b_ref, o_ref, acc_ref):
    @pl.when(pl.program_id(2) == 0)
    def _():
        acc_ref[...] = jnp.zeros_like(acc_ref)

    acc_ref[...] += jnp.dot(a_ref[...], b_ref[...],
                            preferred_element_type=jnp.float32)

    @pl.when(pl.program_id(2) == pl.num_programs(2) - 1)
    def _():
        o_ref[...] = acc_ref[...].astype(o_ref.dtype)


def _matmul_res_kernel(a_ref, b_ref, res_ref, o_ref, acc_ref):
    @pl.when(pl.program_id(2) == 0)
    def _():
        acc_ref[...] = jnp.zeros_like(acc_ref)

    acc_ref[...] += jnp.dot(a_ref[...], b_ref[...],
                            preferred_element_type=jnp.float32)

    @pl.when(pl.program_id(2) == pl.num_programs(2) - 1)
    def _():
        o_ref[...] = (acc_ref[...]
                      + res_ref[...].astype(jnp.float32)).astype(o_ref.dtype)


def pallas_matmul(a, b, residual=None, out_dtype=None,
                  tm_cap=512, tn_cap=512, tk_cap=1024):
    """(M,K)@(K,N) [+ residual] -> (M,N). bf16 operands, f32 VMEM accumulator."""
    M, K = a.shape
    K2, N = b.shape
    assert K == K2
    if out_dtype is None:
        out_dtype = a.dtype
    tm = _pick_tile(M, tm_cap, 8)
    tn = _pick_tile(N, tn_cap, 128)
    tk = _pick_tile(K, tk_cap, 128)

    in_specs = [pl.BlockSpec((tm, tk), lambda i, j, k: (i, k)),
                pl.BlockSpec((tk, tn), lambda i, j, k: (k, j))]
    inputs = [a, b]
    kern = _matmul_kernel
    if residual is not None:
        # residual shares the output tiling; fetched once per (i,j) (constant
        # across the k axis) and added in the epilogue -> no extra HBM pass.
        in_specs.append(pl.BlockSpec((tm, tn), lambda i, j, k: (i, j)))
        inputs.append(residual)
        kern = _matmul_res_kernel

    return pl.pallas_call(
        kern,
        out_shape=jax.ShapeDtypeStruct((M, N), out_dtype),
        grid_spec=pltpu.PrefetchScalarGridSpec(
            num_scalar_prefetch=0,
            grid=(M // tm, N // tn, K // tk),
            in_specs=in_specs,
            out_specs=pl.BlockSpec((tm, tn), lambda i, j, k: (i, j)),
            scratch_shapes=[pltpu.VMEM((tm, tn), jnp.float32)]),
        compiler_params=pltpu.CompilerParams(
            dimension_semantics=("parallel", "parallel", "arbitrary")),
    )(*inputs)


# -------------------------------- RMSNorm ----------------------------------

def _rmsnorm_kernel(x_ref, w_ref, o_ref, *, eps):
    x = x_ref[...].astype(jnp.float32)
    var = jnp.mean(x * x, axis=-1, keepdims=True)
    o_ref[...] = (x * lax.rsqrt(var + eps) * w_ref[...]).astype(o_ref.dtype)


def pallas_rmsnorm(x, w, eps=1e-6, tm_cap=512):
    T, D = x.shape
    tm = _pick_tile(T, tm_cap, 8)
    return pl.pallas_call(
        functools.partial(_rmsnorm_kernel, eps=eps),
        out_shape=jax.ShapeDtypeStruct((T, D), x.dtype),
        grid_spec=pltpu.PrefetchScalarGridSpec(
            num_scalar_prefetch=0,
            grid=(T // tm,),
            in_specs=[pl.BlockSpec((tm, D), lambda i: (i, 0)),
                      pl.BlockSpec((1, D), lambda i: (0, 0))],
            out_specs=pl.BlockSpec((tm, D), lambda i: (i, 0))),
        compiler_params=pltpu.CompilerParams(
            dimension_semantics=("parallel",)),
    )(x, w.reshape(1, D).astype(jnp.float32))


# ---------------- flash-style causal GQA attention (+RoPE) -----------------

def _flash_attn_kernel(q_ref, k_ref, v_ref, cq_ref, sq_ref, ck_ref, sk_ref,
                       o_ref, m_ref, l_ref, acc_ref, *, scale):
    qi = pl.program_id(2)
    kj = pl.program_id(3)
    tq, dh = q_ref.shape
    tkv = k_ref.shape[0]

    @pl.when(kj == 0)
    def _():
        m_ref[...] = jnp.full_like(m_ref, -1e30)
        l_ref[...] = jnp.zeros_like(l_ref)
        acc_ref[...] = jnp.zeros_like(acc_ref)

    # Causal prefill: skip KV tiles that lie entirely above the diagonal
    # (~2x fewer FLOPs; the index_map clamp in the wrapper also elides their
    # K/V DMAs).
    @pl.when(kj * tkv < (qi + 1) * tq)
    def _():
        # In-kernel RoPE (HF rotate_half): f32 math, bf16 onto the MXU.
        # rotate_half(x)*sin == roll(x, dh/2) * sin_signed  (sign folded into
        # the sin table), so the rotation is a single XLU lane-roll.
        qf = q_ref[...].astype(jnp.float32)
        kf = k_ref[...].astype(jnp.float32)
        qr = (qf * cq_ref[...]
              + pltpu.roll(qf, dh // 2, axis=1) * sq_ref[...]).astype(q_ref.dtype)
        kr = (kf * ck_ref[...]
              + pltpu.roll(kf, dh // 2, axis=1) * sk_ref[...]).astype(k_ref.dtype)

        # Contract the last dims directly (no transposed-K relayout).
        s = lax.dot_general(qr, kr, (((1,), (1,)), ((), ())),
                            preferred_element_type=jnp.float32) * scale
        qpos = qi * tq + lax.broadcasted_iota(jnp.int32, (tq, tkv), 0)
        kpos = kj * tkv + lax.broadcasted_iota(jnp.int32, (tq, tkv), 1)
        s = jnp.where(kpos <= qpos, s, -1e30)            # causal (start_pos=0)

        m_prev = m_ref[...]
        m_new = jnp.maximum(m_prev, jnp.max(s, axis=-1, keepdims=True))
        alpha = jnp.exp(m_prev - m_new)
        p = jnp.exp(s - m_new)
        l_ref[...] = alpha * l_ref[...] + jnp.sum(p, axis=-1, keepdims=True)
        acc_ref[...] = alpha * acc_ref[...] + jnp.dot(
            p.astype(v_ref.dtype), v_ref[...], preferred_element_type=jnp.float32)
        m_ref[...] = m_new

    @pl.when(kj == pl.num_programs(3) - 1)
    def _():
        inv_l = pl.reciprocal(l_ref[...], approx=True)
        o_ref[...] = (acc_ref[...] * inv_l).astype(o_ref.dtype)


def pallas_flash_attention(qkv, cos, sin_signed, *, B, S, H, KV, dh,
                           tq_cap=256, tkv_cap=256):
    """Causal GQA flash attention reading the fused token-major
    (T, (H+2KV)*dh) QKV activation directly.  Head selection, GQA K/V sharing
    and RoPE are done through BlockSpec index_maps / in-kernel math, so there
    are no transposes, repeats or extra activation passes in HBM."""
    T = B * S
    G = H // KV
    assert qkv.shape == (T, (H + 2 * KV) * dh)
    tq = _pick_tile(S, tq_cap, 8)
    tkv = _pick_tile(S, tkv_cap, 8)
    n_q, n_kv = S // tq, S // tkv
    scale = 1.0 / math.sqrt(dh)

    def _kv_row(qi, kj):
        # Clamp fully-masked (future) KV tiles onto the last useful tile so
        # the pipeline sees an identical consecutive block index and skips
        # their DMAs entirely.
        return jnp.minimum(kj, (qi * tq + tq - 1) // tkv)

    q_spec = pl.BlockSpec((tq, dh), lambda b, h, qi, kj: (b * n_q + qi, h))
    k_spec = pl.BlockSpec(
        (tkv, dh), lambda b, h, qi, kj: (b * n_kv + _kv_row(qi, kj), H + h // G))
    v_spec = pl.BlockSpec(
        (tkv, dh),
        lambda b, h, qi, kj: (b * n_kv + _kv_row(qi, kj), H + KV + h // G))
    cq_spec = pl.BlockSpec((tq, dh), lambda b, h, qi, kj: (qi, 0))
    sq_spec = pl.BlockSpec((tq, dh), lambda b, h, qi, kj: (qi, 0))
    ck_spec = pl.BlockSpec((tkv, dh), lambda b, h, qi, kj: (_kv_row(qi, kj), 0))
    sk_spec = pl.BlockSpec((tkv, dh), lambda b, h, qi, kj: (_kv_row(qi, kj), 0))

    return pl.pallas_call(
        functools.partial(_flash_attn_kernel, scale=scale),
        out_shape=jax.ShapeDtypeStruct((T, H * dh), qkv.dtype),
        grid_spec=pltpu.PrefetchScalarGridSpec(
            num_scalar_prefetch=0,
            grid=(B, H, n_q, n_kv),
            in_specs=[q_spec, k_spec, v_spec, cq_spec, sq_spec, ck_spec, sk_spec],
            out_specs=pl.BlockSpec((tq, dh), lambda b, h, qi, kj: (b * n_q + qi, h)),
            scratch_shapes=[pltpu.VMEM((tq, 1), jnp.float32),
                            pltpu.VMEM((tq, 1), jnp.float32),
                            pltpu.VMEM((tq, dh), jnp.float32)]),
        compiler_params=pltpu.CompilerParams(
            dimension_semantics=("parallel", "parallel", "parallel", "arbitrary")),
    )(qkv, qkv, qkv, cos, sin_signed, cos, sin_signed)


# --------------------- block-sparse MoE (SwiGLU, F-tiled) -------------------

def _moe_kernel(hit_ref, x_ref, w13_ref, w2_ref, gate_ref, res_ref, o_ref,
                acc_ref):
    i = pl.program_id(0)
    e = pl.program_id(1)
    f = pl.program_id(2)

    @pl.when((e == 0) & (f == 0))
    def _():
        acc_ref[...] = jnp.zeros_like(acc_ref)

    # Block-sparse skip: (token tile, expert) pairs with no routed token do
    # nothing (their weight DMAs are pinned to chunk 0 by the index_maps).
    @pl.when(hit_ref[e * pl.num_programs(0) + i] > 0)
    def _():
        x = x_ref[...]                                        # (tm, D)  bf16
        w1 = w13_ref[0, 0]                                    # (D, tf)  bf16
        w3 = w13_ref[0, 1]                                    # (D, tf)  bf16
        h1 = jnp.dot(x, w1, preferred_element_type=jnp.float32)
        h3 = jnp.dot(x, w3, preferred_element_type=jnp.float32)
        g = h1 * jax.nn.sigmoid(h1) * h3                      # SwiGLU chunk, f32
        y = jnp.dot(g.astype(x.dtype), w2_ref[0],
                    preferred_element_type=jnp.float32)       # (tm, D)  f32
        acc_ref[...] += gate_ref[0] * y

    @pl.when((e == pl.num_programs(1) - 1) & (f == pl.num_programs(2) - 1))
    def _():
        o_ref[...] = (acc_ref[...]
                      + res_ref[...].astype(jnp.float32)).astype(o_ref.dtype)


def pallas_moe(x, w13, w2, gate, residual, tm_cap=256, tf_cap=512):
    """x:(T,D) bf16; w13:(E,2,D,F) stacked [w1;w3]; w2:(E,F,D); gate:(T,E) f32.
    Grid (token-tile, expert, F-chunk) with an f32 (tm,D) accumulator; the
    residual is added in the epilogue.
    TODO(synk): token-sorted grouped matmul (expert-resident weight ordering)
    and expert-axis core split on v7x to remove per-token-tile weight
    re-streaming entirely."""
    T, D = x.shape
    E, two, D2, F = w13.shape
    assert two == 2 and D2 == D and w2.shape == (E, F, D)
    tm = _pick_tile(T, tm_cap, 8)
    tf = _pick_tile(F, tf_cap, 128)
    n_tiles, n_f = T // tm, F // tf

    # Per-(expert, token-tile) routing table -> SMEM via scalar prefetch.
    hit = (gate.reshape(n_tiles, tm, E) > 0).any(axis=1).T        # (E, n_tiles)
    hit = hit.astype(jnp.int32).reshape(-1)                       # flat, e-major
    gate_e = gate.T.reshape(E, T, 1).astype(jnp.float32)

    def w13_map(i, e, f, hit):
        # Missed experts map every F step to chunk 0 -> identical consecutive
        # block index -> all but one of their weight DMAs are elided.
        return (e, 0, 0, f * hit[e * n_tiles + i])

    def w2_map(i, e, f, hit):
        return (e, f * hit[e * n_tiles + i], 0)

    return pl.pallas_call(
        _moe_kernel,
        out_shape=jax.ShapeDtypeStruct((T, D), x.dtype),
        grid_spec=pltpu.PrefetchScalarGridSpec(
            num_scalar_prefetch=1,
            grid=(n_tiles, E, n_f),
            in_specs=[pl.BlockSpec((tm, D), lambda i, e, f, hit: (i, 0)),
                      pl.BlockSpec((1, 2, D, tf), w13_map),
                      pl.BlockSpec((1, tf, D), w2_map),
                      pl.BlockSpec((1, tm, 1), lambda i, e, f, hit: (e, i, 0)),
                      pl.BlockSpec((tm, D), lambda i, e, f, hit: (i, 0))],
            out_specs=pl.BlockSpec((tm, D), lambda i, e, f, hit: (i, 0)),
            scratch_shapes=[pltpu.VMEM((tm, D), jnp.float32)]),
        compiler_params=pltpu.CompilerParams(
            dimension_semantics=("parallel", "arbitrary", "arbitrary")),
    )(hit, x, w13, w2, gate_e, residual)


# ------------------------------- glue (JAX) --------------------------------

def mixtral_forward(params, input_ids, cfg):
    B, S = input_ids.shape
    D, H, KV, dh = cfg["hidden"], cfg["heads"], cfg["kv_heads"], cfg["head_dim"]
    E, K = cfg["num_experts"], cfg["top_k"]
    T = B * S

    # Embedding lookup as a gather (no one-hot matmul).
    h = jnp.take(params["embedding"], input_ids.reshape(-1), axis=0)  # (T,D) bf16

    # RoPE tables (start_pos = 0, first forward with a fresh KV cache).
    # TODO(synk): fused_utils KV-cache bookkeeping (prepare_cache /
    # prepare_input_ids / rolling start_pos) is stateful host logic; semantics
    # here match the first call with an empty cache.
    inv_freq = 1.0 / (cfg["rope_theta"] **
                      (jnp.arange(0, dh, 2, dtype=jnp.float32) / dh))
    freqs = jnp.outer(jnp.arange(S, dtype=jnp.float32), inv_freq)      # (S, dh/2)
    cos = jnp.concatenate([jnp.cos(freqs), jnp.cos(freqs)], axis=-1)   # (S, dh)
    # rotate_half sign folded into the sin table (kernel only needs a roll).
    sin = jnp.concatenate([-jnp.sin(freqs), jnp.sin(freqs)], axis=-1)  # (S, dh)

    for lp in params["blocks"]:
        # ---------------- attention sub-block ----------------
        x = pallas_rmsnorm(h, lp["input_norm"], cfg["eps"])            # (T,D) bf16
        qkv = pallas_matmul(x, lp["wqkv"])                             # (T,(H+2KV)dh)
        attn = pallas_flash_attention(qkv, cos, sin,
                                      B=B, S=S, H=H, KV=KV, dh=dh)     # (T,H*dh)
        h = pallas_matmul(attn, lp["wo"], residual=h)                  # fused + h

        # ---------------- sparse MoE sub-block ----------------
        x = pallas_rmsnorm(h, lp["post_norm"], cfg["eps"])
        # Router output (width E) is tiny and lane-sparse -> keep it in XLA.
        logits = jnp.dot(x, lp["router"], preferred_element_type=jnp.float32)
        probs = jax.nn.softmax(logits, axis=-1)
        topv, topi = jax.lax.top_k(probs, K)
        topv = topv / jnp.sum(topv, axis=-1, keepdims=True)
        gate = jnp.zeros((T, E), jnp.float32)
        gate = gate.at[jnp.arange(T)[:, None], topi].add(topv)
        h = pallas_moe(x, lp["w13"], lp["w2"], gate, residual=h)       # fused + h

    h = pallas_rmsnorm(h, params["final_norm"], cfg["eps"])
    return h.reshape(B, S, D)


# ------------------------- deterministic parameters ------------------------

def init_params(cfg, key):
    D, H, KV, dh = cfg["hidden"], cfg["heads"], cfg["kv_heads"], cfg["head_dim"]
    F, E, L, V = cfg["ffn"], cfg["num_experts"], cfg["layers"], cfg["vocab"]
    scale = 0.05

    def nrm(k, shape):
        return (jax.random.normal(k, shape, jnp.float32) * scale).astype(jnp.bfloat16)

    keys = jax.random.split(key, 1 + L)
    params = {
        "embedding": nrm(keys[0], (V, D)),
        "final_norm": jnp.ones((D,), jnp.float32),
        "blocks": [],
    }
    for l in range(L):
        ks = jax.random.split(keys[1 + l], 6 + 3 * E)
        wq = nrm(ks[0], (D, H * dh))
        wk = nrm(ks[1], (D, KV * dh))
        wv = nrm(ks[2], (D, KV * dh))
        block = {
            "input_norm": jnp.ones((D,), jnp.float32),
            "post_norm": jnp.ones((D,), jnp.float32),
            "wqkv": jnp.concatenate([wq, wk, wv], axis=1),   # fused QKV projection
            "wo": nrm(ks[3], (H * dh, D)),
            "router": nrm(ks[4], (D, E)),
        }
        w13, w2 = [], []
        for e in range(E):
            w1 = nrm(ks[5 + 3 * e + 0], (D, F))
            w3 = nrm(ks[5 + 3 * e + 1], (D, F))
            w2e = nrm(ks[5 + 3 * e + 2], (F, D))
            w13.append(jnp.stack([w1, w3], axis=0))          # (2, D, F)
            w2.append(w2e)
        block["w13"] = jnp.stack(w13)                         # (E, 2, D, F)
        block["w2"] = jnp.stack(w2)                           # (E, F, D)
        params["blocks"].append(block)
    return params


if __name__ == "__main__":
    cfg = dict(vocab=128, hidden=256, heads=2, kv_heads=1, head_dim=128,
               ffn=512, num_experts=4, top_k=2, layers=2,
               rope_theta=10000.0, eps=1e-6)

    key = jax.random.PRNGKey(0)
    pkey, ikey = jax.random.split(key)
    params = init_params(cfg, pkey)

    B, S = 2, 8
    input_ids = jax.random.randint(ikey, (B, S), 0, cfg["vocab"], jnp.int32)

    out = mixtral_forward(params, input_ids, cfg)
    out = jax.block_until_ready(out)
    assert out.shape == (B, S, cfg["hidden"])
    assert bool(jnp.all(jnp.isfinite(out.astype(jnp.float32))))
    print("KERNEL_OK")
</pallas_src>

<mosaic_0001>
module attributes {stable_mosaic.version = 11 : i64} {
  func.func @_rmsnorm_kernel(%arg0: i32, %arg1: memref<16x256xbf16, #tpu.memory_space<vmem>>, %arg2: memref<1x256xf32, #tpu.memory_space<vmem>>, %arg3: memref<16x256xbf16, #tpu.memory_space<vmem>>) attributes {dimension_semantics = [#tpu.dimension_semantics<parallel>], iteration_bounds = array<i64: 1>, scalar_prefetch = 0 : i64, scratch_operands = 0 : i64, tpu.core_type = #tpu.core_type<tc>, window_params = [{transform_indices = @transform_0, window_bounds = array<i64: 16, 256>}, {pipeline_mode = #tpu.pipeline_mode<synchronous>, transform_indices = @transform_1, window_bounds = array<i64: 1, 256>}, {transform_indices = @transform_2, window_bounds = array<i64: 16, 256>}]} {
    %c0 = arith.constant 0 : index
    %c0_0 = arith.constant 0 : index
    %0 = vector.load %arg1[%c0, %c0_0] : memref<16x256xbf16, #tpu.memory_space<vmem>>, vector<16x256xbf16>
    %1 = arith.extf %0 : vector<16x256xbf16> to vector<16x256xf32>
    %2 = arith.mulf %1, %1 : vector<16x256xf32>
    %cst = arith.constant dense<0.000000e+00> : vector<16xf32>
    %3 = vector.multi_reduction <add>, %2, %cst [1] : vector<16x256xf32> to vector<16xf32>
    %4 = vector.shape_cast %3 : vector<16xf32> to vector<16x1xf32>
    %cst_1 = arith.constant 2.560000e+02 : f32
    %5 = vector.broadcast %cst_1 : f32 to vector<16x1xf32>
    %6 = arith.divf %4, %5 : vector<16x1xf32>
    %cst_2 = arith.constant 9.99999997E-7 : f32
    %7 = vector.broadcast %cst_2 : f32 to vector<16x1xf32>
    %8 = arith.addf %6, %7 : vector<16x1xf32>
    %9 = math.rsqrt %8 : vector<16x1xf32>
    %10 = vector.broadcast %9 : vector<16x1xf32> to vector<16x256xf32>
    %11 = arith.mulf %1, %10 : vector<16x256xf32>
    %c0_3 = arith.constant 0 : index
    %c0_4 = arith.constant 0 : index
    %12 = vector.load %arg2[%c0_3, %c0_4] : memref<1x256xf32, #tpu.memory_space<vmem>>, vector<1x256xf32>
    %13 = vector.broadcast %12 : vector<1x256xf32> to vector<16x256xf32>
    %14 = arith.mulf %11, %13 : vector<16x256xf32>
    %15 = arith.truncf %14 : vector<16x256xf32> to vector<16x256xbf16>
    %c0_5 = arith.constant 0 : index
    %c0_6 = arith.constant 0 : index
    %16 = vector.load %arg3[%c0_5, %c0_6] : memref<16x256xbf16, #tpu.memory_space<vmem>>, vector<16x256xbf16>
    tpu.vector_store %arg3[%c0_5, %c0_6], %15 {strides = array<i32>} : memref<16x256xbf16, #tpu.memory_space<vmem>>, vector<16x256xbf16>,
    return
  }
  func.func @transform_0(%arg0: i32) -> (i32, i32) {
    %c0_i32 = arith.constant 0 : i32
    %c0_i32_0 = arith.constant 0 : i32
    return %arg0, %c0_i32 : i32, i32
  }
  func.func @transform_1(%arg0: i32) -> (i32, i32) {
    %c0_i32 = arith.constant 0 : i32
    %c0_i32_0 = arith.constant 0 : i32
    %c0_i32_1 = arith.constant 0 : i32
    return %c0_i32, %c0_i32_0 : i32, i32
  }
  func.func @transform_2(%arg0: i32) -> (i32, i32) {
    %c0_i32 = arith.constant 0 : i32
    %c0_i32_0 = arith.constant 0 : i32
    return %arg0, %c0_i32 : i32, i32
  }
}

</mosaic_0001>

<bundles_post_ra>
// kernel: tpu_custom_call.1
= control target key start
LH: loop header
LB: loop body
LE: loop exit
PB: predicated region body
PF: predicated region fallthrough
CT: control target
= control target key end

     0   :  { %7 = vsyncpa [#allocation3], 0  ;;  %s227_s0 = inlined_call_operand.hbm [shape: bf16[16,256], index: 0, kind: input, shape index: {}]   ;;  %s228_s1 = inlined_call_operand.hbm [shape: f32[1,256], index: 1, kind: input, shape index: {}]   ;;  %s229_s2 = inlined_call_operand.hbm [shape: bf16[16,256], index: 2, kind: output, shape index: {}]  }
   0x1   :  { %8 = vsyncpa [#allocation6], 0 }
   0x2   :  { %9 = vsyncpa [#allocation4], 0  ;;  %s192_s9 = smov [#allocation2]  }
   0x3   :  { %s15_s10 = sshll.u32 %s192_s9, 4  ;;  %s16_s10 = int_to_ptr.vmem [resolvable:$true] %s15_s10 }
   0x4   :  { %s134_s11 = scalar_lea.vmem %s16_s10, 256  ;;  %p139_p1 = scmp.lt.s32.totalorder %s16_s10, %s16_s10 }
   0x5   :  { %p135_p0 = scmp.ne.s32.totalorder %s16_s10, %s134_s11  ;;  %p140_p2 = scmp.lt.s32.totalorder %s134_s11, %s134_s11 }
   0x7   :  { %p141_p3 = por %p140_p2, %p139_p1 }
   0x9   :  { %p142_p4 = pnand %p141_p3, %p135_p0 }
   0xb   :  { %145 = shalt.err (!%p142_p4)
}
   0xc   :  { %s193_s12 = smov 128   ;;  %s194_s13 = smov 8  }
   0xd   :  { %21 = dma.hbm_to_vmem [thread:$0]  %s227_s0, 256, %s16_s10, [#allocation3], %s193_s12, %s193_s12, %s194_s13  }
   0xe   :  { %s195_s16 = smov [#allocation5]  }
   0xf   :  { %s28_s17 = sshll.u32 %s195_s16, 4  ;;  %s29_s17 = int_to_ptr.vmem [resolvable:$true] %s28_s17 }
  0x10   :  { %s154_s18 = scalar_lea.vmem %s29_s17, 32  ;;  %p159_p6 = scmp.lt.s32.totalorder %s29_s17, %s29_s17 }
  0x11   :  { %p155_p5 = scmp.ne.s32.totalorder %s29_s17, %s154_s18  ;;  %p160_p7 = scmp.lt.s32.totalorder %s154_s18, %s154_s18 }
  0x13   :  { %p161_p8 = por %p160_p7, %p159_p6 }
  0x15   :  { %p162_p9 = pnand %p161_p8, %p155_p5 }
  0x17   :  { %165 = shalt.err (!%p162_p9)
}
  0x18   :  { %31 = dma.hbm_to_vmem [thread:$0]  %s228_s1, 32, %s29_s17, [#allocation6]  }
  0x19   :  { %186 = dma.done.wait [#allocation3], 256  }
  0x1a   :  { %187 = vsyncadd [#allocation3], 4294967040 }
  0x1b   :  { %188 = dma.done.wait [#allocation6], 32  }
  0x1c   :  { %189 = vsyncadd [#allocation6], 4294967264  ;;  %v38_v0 = vld [vmem:[#allocation2] sm:$0xff]  ;;  %v39_v1 = vld [vmem:[#allocation2 + $0x8] sm:$0xff]  ;;  %v67_v17 = vlaneseq  ;;  %s196_s0 = smov [#allocation7]  }
  0x1d   :  { %v40_v2 = vunpack.c.l.bf16 %v38_v0  ;;  %v41_v3 = vunpack.c.h.bf16 %v38_v0  ;;  %v42_v4 = vunpack.c.l.bf16 %v39_v1  ;;  %v43_v5 = vunpack.c.h.bf16 %v39_v1  ;;  %v65_v22 = vld [vmem:[#allocation5] sm:$0x3]  ;;  %s100_s1 = sshll.u32 %s196_s0, 4  ;;  %s101_s1 = int_to_ptr.vmem [resolvable:$true] %s100_s1 }
  0x1e   :  { %v68_v19 = vshrl.u32 %v67_v17, 7  ;;  %s166_s21 = scalar_lea.vmem %s101_s1, 256  ;;  %p171_p11 = scmp.lt.s32.totalorder %s101_s1, %s101_s1 }
  0x1f   :  { %v44_v6 = vmul.f32 %v40_v2, %v40_v2  ;;  %v45_v7 = vmul.f32 %v41_v3, %v41_v3  ;;  %v46_v8 = vmul.f32 %v42_v4, %v42_v4  ;;  %v47_v9 = vmul.f32 %v43_v5, %v43_v5  ;;  %p167_p10 = scmp.ne.s32.totalorder %s101_s1, %s166_s21  ;;  %p172_p12 = scmp.lt.s32.totalorder %s166_s21, %s166_s21 }
  0x20   :  { %v69_v20 = vsub.s32 0, %v68_v19  ;;  %v73_v21 = vsub.s32 1, %v68_v19 }
  0x21   :  { %v48_v10 = vadd.f32 %v45_v7, %v44_v6  ;;  %v51_v11 = vadd.f32 %v47_v9, %v46_v8  ;;  %p173_p13 = por %p172_p12, %p171_p11 }
  0x22   :  { %v70_v23 = vrot.slane %v65_v22, %v69_v20  ;;  %v74_v24 = vrot.slane %v65_v22, %v73_v21 }
  0x23   :  { %49 = vadd.xlane.f32.xlu0 %v48_v10  ;;  %p174_p0 = pnand %p173_p13, %p167_p10 }
  0x27   :  { %52 = vadd.xlane.f32.xlu0 %v51_v11 }
  0xac   :  { %v50_v12 = vpop.xlane.xlu0 %49 }
  0xad   :  { %v55_v13 = vmul.f32 0.00390625, %v50_v12 }
  0xaf   :  { %v57_v14 = vadd.f32 1e-06, %v55_v13 }
  0xb0   :  { %v53_v15 = vpop.xlane.xlu0 %52 }
  0xb1   :  { %122 = vrsqrt.f32 %v57_v14  ;;  %v56_v16 = vmul.f32 0.00390625, %v53_v15 }
  0xb3   :  { %v58_v18 = vadd.f32 1e-06, %v56_v16 }
  0xb5   :  { %124 = vrsqrt.f32 %v58_v18 }
  0xbe   :  { %v123_v25 = vpop.eup %122 }
  0xbf   :  { %v61_v26 = vmul.f32 %v123_v25, %v40_v2  ;;  %v62_v27 = vmul.f32 %v123_v25, %v41_v3 }
  0xc1   :  { %v77_v28 = vmul.f32 %v70_v23, %v61_v26  ;;  %v78_v29 = vmul.f32 %v74_v24, %v62_v27 }
  0xc2   :  { %v125_v30 = vpop.eup %124 }
  0xc3   :  { %v63_v31 = vmul.f32 %v125_v30, %v42_v4  ;;  %v64_v32 = vmul.f32 %v125_v30, %v43_v5  ;;  %v115_v33 = vpack.c.bf16 %v78_v29, %v77_v28 }
  0xc5   :  { %v79_v34 = vmul.f32 %v70_v23, %v63_v31  ;;  %v80_v35 = vmul.f32 %v74_v24, %v64_v32  ;;  %93 = vst [vmem:[#allocation7] sm:$0xff] %v115_v33 }
  0xc7   :  { %v116_v36 = vpack.c.bf16 %v80_v35, %v79_v34 }
  0xc9   :  { %94 = vst [vmem:[#allocation7 + $0x8] sm:$0xff] %v116_v36 }
  0xca   :  { %177 = shalt.err (!%p174_p0)
}
  0xcb   :  { %106 = dma.vmem_to_hbm [thread:$0]  %s101_s1, 256, %s229_s2, [#allocation4], %s193_s12, %s193_s12, %s194_s13  }
  0xcc   :  { %190 = dma.done.wait [#allocation4], 256  }
  0xcd   :  { %191 = vsyncadd [#allocation4], 4294967040 }
  0xce   :  { %110 = vsyncpa [#allocation3], 1 }
  0xcf   :  { %111 = vsyncpa [#allocation6], 1 }
  0xd0   :  { %112 = vsyncpa [#allocation4], 1 }

</bundles_post_ra>
